<compile_context>
chip_gen: v7x
topology: tpu7x:2x2x1
jax: 0.10.0
libtpu: 0.0.40
codegen_flags: <defaults>
</compile_context>

<pallas_src>
import functools
import math

import jax
import jax.numpy as jnp
from jax.experimental import pallas as pl
from jax.experimental.pallas import tpu as pltpu


def make_time_encoding_table(d_model: int, max_len: int = 5000) -> jnp.ndarray:
    """Sinusoidal table identical to the PyTorch __init__ (buffer pe[:, 0, :])."""
    position = jnp.arange(0, max_len, dtype=jnp.float32)[:, None]            # [max_len, 1]
    div_term = jnp.exp(
        jnp.arange(0, d_model, 2, dtype=jnp.float32) * (-math.log(10000.0) / d_model)
    )                                                                         # [ceil(d/2)]
    args = position * div_term                                                # [max_len, ceil(d/2)]
    sin_part = jnp.sin(args)
    cos_part = jnp.cos(args)

    pe = jnp.zeros((max_len, d_model), dtype=jnp.float32)
    pe = pe.at[:, 0::2].set(sin_part)
    if d_model % 2 == 1:
        pe = pe.at[:, 1::2].set(cos_part[:, :-1])
    else:
        pe = pe.at[:, 1::2].set(cos_part)
    return pe


def _time_encoding_kernel(x_ref, pe_ref, o_ref, *, batch: int):
    # x_ref / o_ref : (TS, batch * d_model)   -- lane-dense slab
    # pe_ref        : (TS, d_model)
    pe = pe_ref[...]
    if batch > 1:
        # Broadcast pe over the batch axis once per block (lane-axis concat; XLU work,
        # fully hidden under the HBM stream for this memory-bound add).
        pe = jnp.concatenate([pe] * batch, axis=-1)          # (TS, batch*d_model)
    o_ref[...] = (x_ref[...] + pe).astype(o_ref.dtype)


def _pick_seq_tile(seq_len: int, batch: int, d_model: int, itemsize: int,
                   budget_bytes: int = 24 * 1024 * 1024) -> int:
    """Largest seq tile whose double-buffered VMEM footprint stays under budget."""
    # Per sequence row in VMEM: x tile + out tile + pe tile, times 2 for double-buffering.
    per_row = (2 * batch * d_model + d_model) * itemsize * 2
    ts = max(8, budget_bytes // per_row)
    ts = min(ts, 2048)
    if ts >= seq_len:
        return seq_len                      # full extent: always a legal block dim
    return max(8, (ts // 8) * 8)            # sublane-aligned tile


def time_encoding_forward(x: jnp.ndarray, pe_table: jnp.ndarray) -> jnp.ndarray:
    """x: [seq_len, batch, d_model]; pe_table: [max_len, d_model], max_len >= seq_len."""
    seq_len, batch, d_model = x.shape
    assert pe_table.shape[0] >= seq_len and pe_table.shape[1] == d_model

    pe = pe_table[:seq_len].astype(x.dtype)          # like self.pe[:seq_len]; dtype-safe add
    x2 = x.reshape(seq_len, batch * d_model)         # contiguous -> free "layout plumbing"

    ts = _pick_seq_tile(seq_len, batch, d_model, x.dtype.itemsize)
    grid = (pl.cdiv(seq_len, ts),)

    kernel = functools.partial(_time_encoding_kernel, batch=batch)
    out2 = pl.pallas_call(
        kernel,
        out_shape=jax.ShapeDtypeStruct((seq_len, batch * d_model), x.dtype),
        grid=grid,
        in_specs=[
            pl.BlockSpec((ts, batch * d_model), lambda i: (i, 0)),
            pl.BlockSpec((ts, d_model), lambda i: (i, 0)),
        ],
        out_specs=pl.BlockSpec((ts, batch * d_model), lambda i: (i, 0)),
        compiler_params=pltpu.CompilerParams(
            dimension_semantics=("parallel",),       # seq axis shards across v7x's 2 TCs
            vmem_limit_bytes=48 * 1024 * 1024,       # > default scoped limit, < v7x 64 MiB
        ),
    )(x2, pe)
    # TODO(synk): if the caller can donate x, add input_output_aliases={0: 0} to drop the
    # extra HBM output allocation (not done here because the demo reuses x for the check).
    return out2.reshape(seq_len, batch, d_model)


if __name__ == "__main__":
    seq_len, batch, d_model = 8, 2, 32
    max_len = 5000

    key = jax.random.PRNGKey(0)
    x = jax.random.normal(key, (seq_len, batch, d_model), dtype=jnp.float32)
    pe_table = make_time_encoding_table(d_model, max_len)

    fwd = jax.jit(time_encoding_forward)
    out = jax.block_until_ready(fwd(x, pe_table))

    # reference of the PyTorch forward: x + pe[:seq_len] (pe broadcast over batch)
    ref = x + pe_table[:seq_len][:, None, :]
    assert out.shape == (seq_len, batch, d_model)
    assert jnp.allclose(out, ref, atol=1e-6), "mismatch vs reference"

    print("KERNEL_OK")
</pallas_src>

<mosaic_0001>
module attributes {stable_mosaic.version = 11 : i64} {
  func.func @_time_encoding_kernel(%arg0: i32, %arg1: memref<8x64xf32, #tpu.memory_space<vmem>>, %arg2: memref<8x32xf32, #tpu.memory_space<vmem>>, %arg3: memref<8x64xf32, #tpu.memory_space<vmem>>) attributes {dimension_semantics = [#tpu.dimension_semantics<parallel>], iteration_bounds = array<i64: 1>, scalar_prefetch = 0 : i64, scratch_operands = 0 : i64, tpu.core_type = #tpu.core_type<tc>, window_params = [{transform_indices = @transform_0, window_bounds = array<i64: 8, 64>}, {transform_indices = @transform_1, window_bounds = array<i64: 8, 32>}, {transform_indices = @transform_2, window_bounds = array<i64: 8, 64>}]} {
    %c0 = arith.constant 0 : index
    %c0_0 = arith.constant 0 : index
    %0 = vector.load %arg2[%c0, %c0_0] : memref<8x32xf32, #tpu.memory_space<vmem>>, vector<8x32xf32>
    %1 = tpu.concatenate %0, %0 in 1 : vector<8x32xf32>, vector<8x32xf32> -> vector<8x64xf32>
    %c0_1 = arith.constant 0 : index
    %c0_2 = arith.constant 0 : index
    %2 = vector.load %arg1[%c0_1, %c0_2] : memref<8x64xf32, #tpu.memory_space<vmem>>, vector<8x64xf32>
    %3 = arith.addf %2, %1 : vector<8x64xf32>
    %c0_3 = arith.constant 0 : index
    %c0_4 = arith.constant 0 : index
    %4 = vector.load %arg3[%c0_3, %c0_4] : memref<8x64xf32, #tpu.memory_space<vmem>>, vector<8x64xf32>
    tpu.vector_store %arg3[%c0_3, %c0_4], %3 {strides = array<i32>} : memref<8x64xf32, #tpu.memory_space<vmem>>, vector<8x64xf32>,
    return
  }
  func.func @transform_0(%arg0: i32) -> (i32, i32) {
    %c0_i32 = arith.constant 0 : i32
    %c0_i32_0 = arith.constant 0 : i32
    return %arg0, %c0_i32 : i32, i32
  }
  func.func @transform_1(%arg0: i32) -> (i32, i32) {
    %c0_i32 = arith.constant 0 : i32
    %c0_i32_0 = arith.constant 0 : i32
    return %arg0, %c0_i32 : i32, i32
  }
  func.func @transform_2(%arg0: i32) -> (i32, i32) {
    %c0_i32 = arith.constant 0 : i32
    %c0_i32_0 = arith.constant 0 : i32
    return %arg0, %c0_i32 : i32, i32
  }
}

</mosaic_0001>

<bundles_post_ra>
// kernel: time_encoding_forward.1
= control target key start
LH: loop header
LB: loop body
LE: loop exit
PB: predicated region body
PF: predicated region fallthrough
CT: control target
= control target key end

     0   :  { %s27_s11 = smov 32   ;;  %vm16_vm0 = vcmask 261120   ;;  %vm20_vm1 = vcmask 523264   ;;  %s52_s1 = inlined_call_operand.vmem [shape: f32[8,32], index: 1, kind: input, shape index: {}]   ;;  %s53_s0 = inlined_call_operand.vmem [shape: f32[8,64], index: 0, kind: input, shape index: {}]   ;;  %s54_s2 = inlined_call_operand.vmem [shape: f32[8,64], index: 2, kind: output, shape index: {}]  }
   0x1   :  { %v11_v0 = vld [vmem:[%s52_s1] sm:$0xff] }
   0x2   :  { %13 = vrot.lane.b32.xlu0 %v11_v0, %s27_s11  ;;  %v18_v1 = vld [vmem:[%s53_s0] sm:$0xff] }
  0x74   :  { %v14_v2 = vpop.permute.xlu0 %13 }
  0x75   :  { %v17_v3 = vsel %vm16_vm0, %v11_v0, %v14_v2 }
  0x76   :  { %v19_v4 = vadd.f32 %v18_v1, %v17_v3 }
  0x78   :  { %21 = vst.msk [vmem:[%s54_s2] sm:$0xff] %vm20_vm1, %v19_v4 }

</bundles_post_ra>
